<compile_context>
chip_gen: v5e
topology: v5e:2x2
jax: 0.10.0
libtpu: 0.0.40
codegen_flags: <defaults>
</compile_context>

<pallas_src>
import functools
import numpy as np

import jax
import jax.numpy as jnp
from jax.experimental import pallas as pl
from jax.experimental.pallas import tpu as pltpu


# ----------------------------------------------------------------------------
# Global knobs
# ----------------------------------------------------------------------------

MXU_DTYPE = jnp.bfloat16      # MXU operand dtype (f32 accumulation everywhere)
_TM = 256                     # activation row tile (256-512 ~ HBM roofline)
_WB_TARGET = 32               # windows per attention grid step (x heads ~ 64-128 groups)

_CPARAMS = pltpu.CompilerParams(
    dimension_semantics=("parallel",),
    vmem_limit_bytes=32 * 1024 * 1024,   # explicit VMEM budget (safe on v5e/v6e/v7x)
)


def _row_tile(M, tm=_TM):
    """Row tile + grid.  Keeps tm fixed for large M (cdiv grid, partial last tile
    handled by Pallas); only shrinks for tiny M (rounded up to a sublane multiple)."""
    if M <= tm:
        tm = max(8, -(-M // 8) * 8)
    return tm, pl.cdiv(M, tm)


def _row_spec(tm, ncols):
    return pl.BlockSpec((tm, ncols), lambda i: (i, 0))


def _bcast_spec(shape):
    nd = len(shape)
    return pl.BlockSpec(shape, lambda i: (0,) * nd)


# ----------------------------------------------------------------------------
# In-kernel math helpers
# ----------------------------------------------------------------------------

def _mxdot(x, w):
    """MXU matmul: bf16 operands, f32 accumulation."""
    return jnp.dot(x.astype(MXU_DTYPE), w.astype(MXU_DTYPE),
                   preferred_element_type=jnp.float32)


def _ln(x, g, b, eps=1e-5):
    mu = jnp.mean(x, axis=-1, keepdims=True)
    xc = x - mu
    var = jnp.mean(xc * xc, axis=-1, keepdims=True)
    return (xc * jax.lax.rsqrt(var + eps)) * g + b


def _gelu(y):
    # TODO(synk): PyTorch nn.GELU defaults to exact erf; tanh approximation used for
    # Mosaic-safe (EUP tanh) lowering.
    return 0.5 * y * (1.0 + jnp.tanh(0.7978845608028654 * (y + 0.044715 * y * y * y)))


# ----------------------------------------------------------------------------
# Pallas kernels
# ----------------------------------------------------------------------------

def _matmul_kernel(x_ref, w_ref, b_ref, o_ref, *, act):
    y = _mxdot(x_ref[...], w_ref[...]) + b_ref[...]
    if act == "gelu":
        y = _gelu(y)
    o_ref[...] = y.astype(o_ref.dtype)


def pallas_matmul(x, w, b=None, act="none"):
    """y = act(x @ w + b);  x: (M, K), w: (K, N)."""
    M, K = x.shape
    N = w.shape[1]
    if b is None:
        b = jnp.zeros((N,), jnp.float32)
    tm, g = _row_tile(M)
    return pl.pallas_call(
        functools.partial(_matmul_kernel, act=act),
        out_shape=jax.ShapeDtypeStruct((M, N), x.dtype),
        grid=(g,),
        in_specs=[_row_spec(tm, K), _bcast_spec((K, N)), _bcast_spec((1, N))],
        out_specs=_row_spec(tm, N),
        compiler_params=_CPARAMS,
    )(x, w, jnp.reshape(b, (1, N)).astype(jnp.float32))


def _layernorm_kernel(x_ref, g_ref, b_ref, o_ref):
    x = x_ref[...].astype(jnp.float32)
    o_ref[...] = _ln(x, g_ref[...], b_ref[...]).astype(o_ref.dtype)


def pallas_layernorm(x, gamma, beta):
    shape = x.shape
    C = shape[-1]
    x2 = x.reshape(-1, C)
    M = x2.shape[0]
    tm, g = _row_tile(M)
    out = pl.pallas_call(
        _layernorm_kernel,
        out_shape=jax.ShapeDtypeStruct((M, C), x.dtype),
        grid=(g,),
        in_specs=[_row_spec(tm, C), _bcast_spec((1, C)), _bcast_spec((1, C))],
        out_specs=_row_spec(tm, C),
        compiler_params=_CPARAMS,
    )(x2, gamma.reshape(1, C), beta.reshape(1, C))
    return out.reshape(shape)


def _matmul_ln_kernel(x_ref, w_ref, b_ref, g_ref, beta_ref, o_ref):
    """1x1 conv (per-pixel matmul) fused with the following LayerNorm (ln0)."""
    y = _mxdot(x_ref[...], w_ref[...]) + b_ref[...]
    o_ref[...] = _ln(y, g_ref[...], beta_ref[...]).astype(o_ref.dtype)


def pallas_matmul_ln(x, w, b, gamma, beta):
    M, K = x.shape
    N = w.shape[1]
    tm, g = _row_tile(M)
    return pl.pallas_call(
        _matmul_ln_kernel,
        out_shape=jax.ShapeDtypeStruct((M, N), x.dtype),
        grid=(g,),
        in_specs=[_row_spec(tm, K), _bcast_spec((K, N)), _bcast_spec((1, N)),
                  _bcast_spec((1, N)), _bcast_spec((1, N))],
        out_specs=_row_spec(tm, N),
        compiler_params=_CPARAMS,
    )(x, w, b.reshape(1, N), gamma.reshape(1, N), beta.reshape(1, N))


def _ln_matmul_kernel(x_ref, g_ref, b_ref, w_ref, bw_ref, o_ref):
    """LayerNorm fused with the following linear (patch_embed_inverse)."""
    xn = _ln(x_ref[...].astype(jnp.float32), g_ref[...], b_ref[...])
    o_ref[...] = (_mxdot(xn, w_ref[...]) + bw_ref[...]).astype(o_ref.dtype)


def pallas_ln_matmul(x, gamma, beta, w, b):
    M, K = x.shape
    N = w.shape[1]
    tm, g = _row_tile(M)
    return pl.pallas_call(
        _ln_matmul_kernel,
        out_shape=jax.ShapeDtypeStruct((M, N), x.dtype),
        grid=(g,),
        in_specs=[_row_spec(tm, K), _bcast_spec((1, K)), _bcast_spec((1, K)),
                  _bcast_spec((K, N)), _bcast_spec((1, N))],
        out_specs=_row_spec(tm, N),
        compiler_params=_CPARAMS,
    )(x, gamma.reshape(1, K), beta.reshape(1, K), w, b.reshape(1, N))


def _ln_qkv_kernel(x_ref, g_ref, b_ref, wq_ref, wk_ref, wv_ref,
                   bq_ref, bk_ref, bv_ref, q_ref, k_ref, v_ref):
    """LN1 fused with the QKV projection; q/k/v emitted as three channel-last outputs."""
    xn = _ln(x_ref[...].astype(jnp.float32), g_ref[...], b_ref[...])
    xb = xn.astype(MXU_DTYPE)
    q_ref[...] = (_mxdot(xb, wq_ref[...]) + bq_ref[...]).astype(q_ref.dtype)
    k_ref[...] = (_mxdot(xb, wk_ref[...]) + bk_ref[...]).astype(k_ref.dtype)
    v_ref[...] = (_mxdot(xb, wv_ref[...]) + bv_ref[...]).astype(v_ref.dtype)


def pallas_ln_qkv(x, gamma, beta, wq, wk, wv, bq, bk, bv):
    M, C = x.shape
    tm, g = _row_tile(M)
    return pl.pallas_call(
        _ln_qkv_kernel,
        out_shape=tuple(jax.ShapeDtypeStruct((M, C), x.dtype) for _ in range(3)),
        grid=(g,),
        in_specs=[_row_spec(tm, C), _bcast_spec((1, C)), _bcast_spec((1, C)),
                  _bcast_spec((C, C)), _bcast_spec((C, C)), _bcast_spec((C, C)),
                  _bcast_spec((1, C)), _bcast_spec((1, C)), _bcast_spec((1, C))],
        out_specs=tuple(_row_spec(tm, C) for _ in range(3)),
        compiler_params=_CPARAMS,
    )(x, gamma.reshape(1, C), beta.reshape(1, C), wq, wk, wv,
      bq.reshape(1, C), bk.reshape(1, C), bv.reshape(1, C))


def _window_attn_proj_kernel(q_ref, k_ref, v_ref, bias_ref, *rest,
                             scale, num_heads, use_mask):
    """Multi-window, multi-head attention + output projection.

    q/k/v blocks: (Wb, N, C) channel-last (heads split in-kernel on the lane axis so
    no head transposes ever touch HBM).  bias: (h, N, N).  mask: (Wb, N, N)."""
    if use_mask:
        mask_ref, pw_ref, pb_ref, o_ref = rest
    else:
        pw_ref, pb_ref, o_ref = rest
    Wb, N, C = q_ref.shape
    d = C // num_heads

    q = q_ref[...].astype(jnp.float32)
    k = k_ref[...].astype(jnp.float32)
    v = v_ref[...].astype(jnp.float32)
    bias = bias_ref[...].astype(jnp.float32)                     # (h, N, N)
    if use_mask:
        mask = mask_ref[...].astype(jnp.float32)                 # (Wb, N, N)
    pw = pw_ref[...]                                             # (C, C), bf16

    acc = jnp.zeros((Wb * N, C), jnp.float32)
    for h in range(num_heads):
        qh = q[:, :, h * d:(h + 1) * d]
        kh = k[:, :, h * d:(h + 1) * d]
        vh = v[:, :, h * d:(h + 1) * d]
        s = jnp.einsum("wnd,wmd->wnm", qh.astype(MXU_DTYPE), kh.astype(MXU_DTYPE),
                       preferred_element_type=jnp.float32) * scale
        s = s + bias[h][None, :, :]
        if use_mask:
            s = s + mask
        s = s - jnp.max(s, axis=-1, keepdims=True)
        p = jnp.exp(s)
        p = p * pl.reciprocal(jnp.sum(p, axis=-1, keepdims=True), approx=True)
        oh = jnp.einsum("wnm,wmd->wnd", p.astype(MXU_DTYPE), vh.astype(MXU_DTYPE),
                        preferred_element_type=jnp.float32)
        # head-merge + output projection fused: concat_h(oh) @ pw == sum_h oh @ pw[hd:(h+1)d]
        acc = acc + _mxdot(oh.reshape(Wb * N, d), pw[h * d:(h + 1) * d, :])

    out = acc + pb_ref[...]
    o_ref[...] = out.reshape(Wb, N, C).astype(o_ref.dtype)


def pallas_window_attention_proj(q, k, v, bias, mask, pw, pb, scale, num_heads, nW):
    """q,k,v: (BW, N, C) with BW = B*nW ordered (batch, window); bias: (h,N,N);
    mask: (nW,N,N) or None; pw,pb: output projection."""
    BW, N, C = q.shape
    # largest divisor of nW not exceeding the target -> Wb windows per grid step
    wb = 1
    for cand in range(1, min(nW, _WB_TARGET) + 1):
        if nW % cand == 0:
            wb = cand
    grid = (BW // wb,)
    nWb = nW // wb
    use_mask = mask is not None

    in_specs = [
        pl.BlockSpec((wb, N, C), lambda g: (g, 0, 0)),
        pl.BlockSpec((wb, N, C), lambda g: (g, 0, 0)),
        pl.BlockSpec((wb, N, C), lambda g: (g, 0, 0)),
        pl.BlockSpec((num_heads, N, N), lambda g: (0, 0, 0)),
    ]
    args = [q, k, v, bias]
    if use_mask:
        # window position within a batch element = global window index mod nW
        in_specs.append(pl.BlockSpec((wb, N, N), lambda g: (g % nWb, 0, 0)))
        args.append(mask)
    in_specs += [_bcast_spec((C, C)), _bcast_spec((1, C))]
    args += [pw, pb.reshape(1, C)]

    return pl.pallas_call(
        functools.partial(_window_attn_proj_kernel, scale=scale,
                          num_heads=num_heads, use_mask=use_mask),
        out_shape=jax.ShapeDtypeStruct((BW, N, C), q.dtype),
        grid=grid,
        in_specs=in_specs,
        out_specs=pl.BlockSpec((wb, N, C), lambda g: (g, 0, 0)),
        compiler_params=_CPARAMS,
    )(*args)


def _add_ln_mlp_kernel(a_ref, r_ref, g_ref, b_ref, w1_ref, b1_ref, w2_ref, b2_ref, o_ref):
    """out = h + MLP(LN2(h)) with h = shortcut + attn;  both residual adds fused."""
    h = a_ref[...].astype(jnp.float32) + r_ref[...].astype(jnp.float32)
    xn = _ln(h, g_ref[...], b_ref[...])
    y = _gelu(_mxdot(xn, w1_ref[...]) + b1_ref[...])
    y = _mxdot(y, w2_ref[...]) + b2_ref[...]
    o_ref[...] = (h + y).astype(o_ref.dtype)


def pallas_add_ln_mlp(a, r, gamma, beta, w1, b1, w2, b2):
    M, C = a.shape
    H = w1.shape[1]
    tm, g = _row_tile(M)
    return pl.pallas_call(
        _add_ln_mlp_kernel,
        out_shape=jax.ShapeDtypeStruct((M, C), a.dtype),
        grid=(g,),
        in_specs=[_row_spec(tm, C), _row_spec(tm, C),
                  _bcast_spec((1, C)), _bcast_spec((1, C)),
                  _bcast_spec((C, H)), _bcast_spec((1, H)),
                  _bcast_spec((H, C)), _bcast_spec((1, C))],
        out_specs=_row_spec(tm, C),
        compiler_params=_CPARAMS,
    )(a, r, gamma.reshape(1, C), beta.reshape(1, C),
      w1, b1.reshape(1, H), w2, b2.reshape(1, C))


# ----------------------------------------------------------------------------
# Static (numpy) helpers: Swin relative position index & shifted-window mask
# ----------------------------------------------------------------------------

@functools.lru_cache(maxsize=None)
def relative_position_index(ws):
    coords = np.stack(np.meshgrid(np.arange(ws), np.arange(ws), indexing="ij"))
    flat = coords.reshape(2, -1)
    rel = flat[:, :, None] - flat[:, None, :]
    rel = rel.transpose(1, 2, 0) + (ws - 1)
    idx = rel[..., 0] * (2 * ws - 1) + rel[..., 1]
    return idx                                                    # (N, N) int


@functools.lru_cache(maxsize=None)
def compute_attn_mask_np(H, W, ws, shift):
    if shift == 0:
        return None
    nW = (H // ws) * (W // ws)
    N = ws * ws
    img_mask = np.zeros((H, W), np.float32)
    cnt = 0
    for hs in (slice(0, -ws), slice(-ws, -shift), slice(-shift, None)):
        for wsl in (slice(0, -ws), slice(-ws, -shift), slice(-shift, None)):
            img_mask[hs, wsl] = cnt
            cnt += 1
    mw = img_mask.reshape(H // ws, ws, W // ws, ws).transpose(0, 2, 1, 3).reshape(nW, N)
    am = mw[:, None, :] - mw[:, :, None]
    return np.where(am != 0, -100.0, 0.0).astype(np.float32)


# ----------------------------------------------------------------------------
# Model pieces (glue around the Pallas kernels)
# ----------------------------------------------------------------------------

def reshape_wav2img(x, freq_ratio):
    # TODO(synk): the original HTS-AT helper may include interpolation/padding to a
    # target spec size; only the core interleaving reshape is reproduced.
    B, C, T, F = x.shape
    x = jnp.transpose(x, (0, 1, 3, 2))
    x = x.reshape(B, C, F, freq_ratio, T // freq_ratio)
    x = jnp.transpose(x, (0, 1, 3, 2, 4))
    x = x.reshape(B, C, F * freq_ratio, T // freq_ratio)
    return x


def reshape_img2wav(x, freq_ratio):
    B, C, H, W = x.shape
    x = x.reshape(B, C, freq_ratio, H // freq_ratio, W)
    x = jnp.transpose(x, (0, 1, 3, 2, 4))
    x = x.reshape(B, C, H // freq_ratio, freq_ratio * W)
    x = jnp.transpose(x, (0, 1, 3, 2))
    return x


def swin_block(x, H, W, p):
    B, L, C = x.shape
    ws, shift, nh = p["ws"], p["shift"], p["num_heads"]
    N = ws * ws
    nW = (H // ws) * (W // ws)
    scale = (C // nh) ** -0.5

    shortcut = x

    # Window partition of the pre-norm x (LayerNorm is per-token over channels, so it
    # commutes with the token permutation; LN1 is fused into the QKV kernel).
    x2 = x.reshape(B, H, W, C)
    if shift > 0:
        x2 = jnp.roll(x2, shift=(-shift, -shift), axis=(1, 2))
    xw = x2.reshape(B, H // ws, ws, W // ws, ws, C)
    xw = jnp.transpose(xw, (0, 1, 3, 2, 4, 5)).reshape(B * nW * N, C)

    q, k, v = pallas_ln_qkv(xw, p["norm1_g"], p["norm1_b"],
                            p["wq"], p["wk"], p["wv"], p["bq"], p["bk"], p["bv"])
    BW = B * nW
    q = q.reshape(BW, N, C)
    k = k.reshape(BW, N, C)
    v = v.reshape(BW, N, C)

    attn = pallas_window_attention_proj(q, k, v, p["attn_bias"], p["attn_mask"],
                                        p["proj_w"], p["proj_b"], scale, nh, nW)

    # window reverse
    xr = attn.reshape(B, H // ws, W // ws, ws, ws, C)
    xr = jnp.transpose(xr, (0, 1, 3, 2, 4, 5)).reshape(B, H, W, C)
    if shift > 0:
        xr = jnp.roll(xr, shift=(shift, shift), axis=(1, 2))
    attn_tokens = xr.reshape(B * L, C)

    # residual + LN2 + MLP + residual fused (drop_path = identity)
    out = pallas_add_ln_mlp(shortcut.reshape(B * L, C), attn_tokens,
                            p["norm2_g"], p["norm2_b"],
                            p["fc1_w"], p["fc1_b"], p["fc2_w"], p["fc2_b"])
    return out.reshape(B, L, C)


def patch_separate(x, H, W, p):
    """Inverse of PatchMerging: dim -> dim/2, (H, W) -> (2H, 2W)."""
    B, L, C = x.shape
    x = pallas_matmul(x.reshape(B * L, C), p["expand_w"])         # no bias
    x = x.reshape(B, H, W, 2, 2, C // 2)
    x = jnp.transpose(x, (0, 1, 3, 2, 4, 5)).reshape(B, 4 * H * W, C // 2)
    x = pallas_layernorm(x, p["norm_g"], p["norm_b"])
    return x, 2 * H, 2 * W


def patch_embed_inverse(x, H, W, p, patch_size, ds_ratio, out_ch=1):
    """Tokens (B, L, embed_dim) -> spectrogram image (B, out_ch, H*ps, W*ps)."""
    B, L, C = x.shape
    ps = patch_size * ds_ratio
    x = pallas_ln_matmul(x.reshape(B * L, C), p["norm_g"], p["norm_b"],
                         p["proj_w"], p["proj_b"])
    x = x.reshape(B, H, W, ps, ps, out_ch)
    x = jnp.transpose(x, (0, 5, 1, 3, 2, 4)).reshape(B, out_ch, H * ps, W * ps)
    return x


def st_decoder_forward(latent_wav, prepared, cfg):
    x = reshape_wav2img(latent_wav, cfg["freq_ratio"])            # (B, Cin, H, W)
    B, Cin, H, W = x.shape

    # latent_head_inverse (1x1 Conv2d == per-pixel matmul) fused with ln0
    xt = jnp.transpose(x, (0, 2, 3, 1)).reshape(B * H * W, Cin)
    xt = pallas_matmul_ln(xt, prepared["head_w"], prepared["head_b"],
                          prepared["ln0_g"], prepared["ln0_b"])
    C = cfg["st_dim"]
    x = xt.reshape(B, H * W, C)

    for layer_p in prepared["layers"]:
        for blk in layer_p["blocks"]:
            x = swin_block(x, H, W, blk)
        if layer_p["upsample"] is not None:
            x, H, W = patch_separate(x, H, W, layer_p["upsample"])

    # pos_drop: identity (eval / drop_rate = 0)
    x = patch_embed_inverse(x, H, W, prepared["pei"], cfg["patch_size"], cfg["ds_ratio"])
    return reshape_img2wav(x, cfg["freq_ratio"])


# ----------------------------------------------------------------------------
# One-time preparation: bias gather, shift masks, weight split / bf16 cast
# ----------------------------------------------------------------------------

def prepare_decoder(params, cfg, latent_shape):
    B, Cl, T, F = latent_shape
    H = F * cfg["freq_ratio"]
    W = T // cfg["freq_ratio"]
    ws_cfg = cfg["window_size"]

    prepared = {
        "head_w": params["head_w"].astype(MXU_DTYPE),
        "head_b": params["head_b"],
        "ln0_g": params["ln0_g"], "ln0_b": params["ln0_b"],
        "layers": [],
    }
    for i, layer_p in enumerate(params["layers"]):
        nh = cfg["num_heads"][i]
        blocks = []
        for d, blk in enumerate(layer_p["blocks"]):
            shift = 0 if (d % 2 == 0) else ws_cfg // 2
            ws = ws_cfg
            if min(H, W) <= ws:                     # whole-image window, no shift
                shift = 0
                ws = min(H, W)
            idx = relative_position_index(ws)                                # (N, N)
            bias = jnp.transpose(blk["rel_table"][idx], (2, 0, 1))           # (nh, N, N)
            mask_np = compute_attn_mask_np(H, W, ws, shift)
            dim = blk["qkv_w"].shape[0]
            qkv_w = blk["qkv_w"].astype(MXU_DTYPE)
            blocks.append({
                "ws": ws, "shift": shift, "num_heads": nh,
                "norm1_g": blk["norm1_g"], "norm1_b": blk["norm1_b"],
                "wq": qkv_w[:, 0:dim], "wk": qkv_w[:, dim:2 * dim], "wv": qkv_w[:, 2 * dim:],
                "bq": blk["qkv_b"][0:dim], "bk": blk["qkv_b"][dim:2 * dim],
                "bv": blk["qkv_b"][2 * dim:],
                "attn_bias": bias.astype(jnp.float32),
                "attn_mask": None if mask_np is None else jnp.asarray(mask_np),
                "proj_w": blk["proj_w"].astype(MXU_DTYPE), "proj_b": blk["proj_b"],
                "norm2_g": blk["norm2_g"], "norm2_b": blk["norm2_b"],
                "fc1_w": blk["fc1_w"].astype(MXU_DTYPE), "fc1_b": blk["fc1_b"],
                "fc2_w": blk["fc2_w"].astype(MXU_DTYPE), "fc2_b": blk["fc2_b"],
            })
        up = None
        if layer_p["upsample"] is not None:
            up = {
                "expand_w": layer_p["upsample"]["expand_w"].astype(MXU_DTYPE),
                "norm_g": layer_p["upsample"]["norm_g"],
                "norm_b": layer_p["upsample"]["norm_b"],
            }
            H, W = 2 * H, 2 * W
        prepared["layers"].append({"blocks": blocks, "upsample": up})

    prepared["pei"] = {
        "norm_g": params["pei"]["norm_g"], "norm_b": params["pei"]["norm_b"],
        "proj_w": params["pei"]["proj_w"].astype(MXU_DTYPE),
        "proj_b": params["pei"]["proj_b"],
    }
    return prepared


# ----------------------------------------------------------------------------
# Deterministic parameter init (synthetic; matches module shapes)
# ----------------------------------------------------------------------------

def init_params(key, cfg):
    keys = iter(jax.random.split(key, 256))

    def nrm(shape, scale=0.02):
        return (scale * jax.random.normal(next(keys), shape)).astype(jnp.float32)

    ones = lambda n: jnp.ones((n,), jnp.float32)
    zeros = lambda n: jnp.zeros((n,), jnp.float32)

    st_dim = cfg["st_dim"]
    ws = cfg["window_size"]
    params = {
        "head_w": nrm((cfg["latent_ch"], st_dim)),
        "head_b": zeros(st_dim),
        "ln0_g": ones(st_dim),
        "ln0_b": zeros(st_dim),
        "layers": [],
    }
    num_layers = len(cfg["depths"])
    for i in range(num_layers):
        dim = st_dim // (2 ** i)
        hidden = int(dim * cfg["mlp_ratio"])
        nh = cfg["num_heads"][i]
        blocks = []
        for _ in range(cfg["depths"][i]):
            blocks.append({
                "norm1_g": ones(dim), "norm1_b": zeros(dim),
                "qkv_w": nrm((dim, 3 * dim)), "qkv_b": zeros(3 * dim),
                "rel_table": nrm(((2 * ws - 1) ** 2, nh)),
                "proj_w": nrm((dim, dim)), "proj_b": zeros(dim),
                "norm2_g": ones(dim), "norm2_b": zeros(dim),
                "fc1_w": nrm((dim, hidden)), "fc1_b": zeros(hidden),
                "fc2_w": nrm((hidden, dim)), "fc2_b": zeros(dim),
            })
        layer = {"blocks": blocks, "upsample": None}
        if i < num_layers - 1:
            layer["upsample"] = {
                "expand_w": nrm((dim, 2 * dim)),
                "norm_g": ones(dim // 2), "norm_b": zeros(dim // 2),
            }
        params["layers"].append(layer)

    ps = cfg["patch_size"] * cfg["ds_ratio"]
    params["pei"] = {
        "norm_g": ones(cfg["embed_dim"]), "norm_b": zeros(cfg["embed_dim"]),
        "proj_w": nrm((cfg["embed_dim"], ps * ps * 1)), "proj_b": zeros(ps * ps * 1),
    }
    return params


# ----------------------------------------------------------------------------
# Main
# ----------------------------------------------------------------------------

if __name__ == "__main__":
    cfg = dict(
        embed_dim=8,
        st_dim=8 * 2 ** (3 - 1),       # embed_dim * 2^(len(EC_depth)-1) = 32
        latent_ch=8,
        patch_size=2,
        ds_ratio=1,                    # extra_downsample_ratio
        window_size=4,
        freq_ratio=2,                  # spec_size // mel_bins = 16 // 8
        mlp_ratio=2.0,
        depths=(2, 2, 2),              # DC_depth
        num_heads=(4, 2, 2),           # DC_num_head
    )

    key = jax.random.PRNGKey(0)
    pkey, xkey = jax.random.split(key)
    params = init_params(pkey, cfg)

    # latent_wav NCHW: (B=2, latent_ch=8, T=8, F=2)  ->  image 4x4 after wav2img
    latent_wav = jax.random.normal(xkey, (2, cfg["latent_ch"], 8, 2), jnp.float32)

    prepared = prepare_decoder(params, cfg, latent_wav.shape)
    out = st_decoder_forward(latent_wav, prepared, cfg)
    out = jax.block_until_ready(out)

    assert out.shape == (2, 1, 64, 16), out.shape
    assert bool(jnp.all(jnp.isfinite(out)))
    print("KERNEL_OK")
</pallas_src>

<mosaic_0001>
module attributes {stable_mosaic.version = 11 : i64} {
  func.func @_matmul_ln_kernel(%arg0: i32, %arg1: memref<32x8xf32, #tpu.memory_space<vmem>>, %arg2: memref<8x32xbf16, #tpu.memory_space<vmem>>, %arg3: memref<1x32xf32, #tpu.memory_space<vmem>>, %arg4: memref<1x32xf32, #tpu.memory_space<vmem>>, %arg5: memref<1x32xf32, #tpu.memory_space<vmem>>, %arg6: memref<32x32xf32, #tpu.memory_space<vmem>>) attributes {dimension_semantics = [#tpu.dimension_semantics<parallel>], iteration_bounds = array<i64: 1>, scalar_prefetch = 0 : i64, scratch_operands = 0 : i64, tpu.core_type = #tpu.core_type<tc>, window_params = [{transform_indices = @transform_0, window_bounds = array<i64: 32, 8>}, {pipeline_mode = #tpu.pipeline_mode<synchronous>, transform_indices = @transform_1, window_bounds = array<i64: 8, 32>}, {pipeline_mode = #tpu.pipeline_mode<synchronous>, transform_indices = @transform_2, window_bounds = array<i64: 1, 32>}, {pipeline_mode = #tpu.pipeline_mode<synchronous>, transform_indices = @transform_3, window_bounds = array<i64: 1, 32>}, {pipeline_mode = #tpu.pipeline_mode<synchronous>, transform_indices = @transform_4, window_bounds = array<i64: 1, 32>}, {transform_indices = @transform_5, window_bounds = array<i64: 32, 32>}]} {
    %c0 = arith.constant 0 : index
    %c0_0 = arith.constant 0 : index
    %0 = vector.load %arg1[%c0, %c0_0] : memref<32x8xf32, #tpu.memory_space<vmem>>, vector<32x8xf32>
    %c0_1 = arith.constant 0 : index
    %c0_2 = arith.constant 0 : index
    %1 = vector.load %arg2[%c0_1, %c0_2] : memref<8x32xbf16, #tpu.memory_space<vmem>>, vector<8x32xbf16>
    %2 = arith.truncf %0 : vector<32x8xf32> to vector<32x8xbf16>
    %cst = arith.constant dense<0.000000e+00> : vector<32x32xf32>
    %3 = tpu.matmul %2, %1, %cst {dimension_numbers = #tpu.dot_dimension_numbers<[1], [0], [0], [1], [0, 0, 1, 1], [], []>} : vector<32x8xbf16>, vector<8x32xbf16>, vector<32x32xf32> -> vector<32x32xf32>
    %c0_3 = arith.constant 0 : index
    %c0_4 = arith.constant 0 : index
    %4 = vector.load %arg3[%c0_3, %c0_4] : memref<1x32xf32, #tpu.memory_space<vmem>>, vector<1x32xf32>
    %5 = vector.broadcast %4 : vector<1x32xf32> to vector<32x32xf32>
    %6 = arith.addf %3, %5 : vector<32x32xf32>
    %c0_5 = arith.constant 0 : index
    %c0_6 = arith.constant 0 : index
    %7 = vector.load %arg4[%c0_5, %c0_6] : memref<1x32xf32, #tpu.memory_space<vmem>>, vector<1x32xf32>
    %c0_7 = arith.constant 0 : index
    %c0_8 = arith.constant 0 : index
    %8 = vector.load %arg5[%c0_7, %c0_8] : memref<1x32xf32, #tpu.memory_space<vmem>>, vector<1x32xf32>
    %cst_9 = arith.constant dense<0.000000e+00> : vector<32xf32>
    %9 = vector.multi_reduction <add>, %6, %cst_9 [1] : vector<32x32xf32> to vector<32xf32>
    %10 = vector.shape_cast %9 : vector<32xf32> to vector<32x1xf32>
    %cst_10 = arith.constant 3.200000e+01 : f32
    %11 = vector.broadcast %cst_10 : f32 to vector<32x1xf32>
    %12 = arith.divf %10, %11 : vector<32x1xf32>
    %13 = vector.broadcast %12 : vector<32x1xf32> to vector<32x32xf32>
    %14 = arith.subf %6, %13 : vector<32x32xf32>
    %15 = arith.mulf %14, %14 : vector<32x32xf32>
    %cst_11 = arith.constant dense<0.000000e+00> : vector<32xf32>
    %16 = vector.multi_reduction <add>, %15, %cst_11 [1] : vector<32x32xf32> to vector<32xf32>
    %17 = vector.shape_cast %16 : vector<32xf32> to vector<32x1xf32>
    %cst_12 = arith.constant 3.200000e+01 : f32
    %18 = vector.broadcast %cst_12 : f32 to vector<32x1xf32>
    %19 = arith.divf %17, %18 : vector<32x1xf32>
    %cst_13 = arith.constant 9.99999974E-6 : f32
    %20 = vector.broadcast %cst_13 : f32 to vector<32x1xf32>
    %21 = arith.addf %19, %20 : vector<32x1xf32>
    %22 = math.rsqrt %21 : vector<32x1xf32>
    %23 = vector.broadcast %22 : vector<32x1xf32> to vector<32x32xf32>
    %24 = arith.mulf %14, %23 : vector<32x32xf32>
    %25 = vector.broadcast %7 : vector<1x32xf32> to vector<32x32xf32>
    %26 = arith.mulf %24, %25 : vector<32x32xf32>
    %27 = vector.broadcast %8 : vector<1x32xf32> to vector<32x32xf32>
    %28 = arith.addf %26, %27 : vector<32x32xf32>
    %c0_14 = arith.constant 0 : index
    %c0_15 = arith.constant 0 : index
    %29 = vector.load %arg6[%c0_14, %c0_15] : memref<32x32xf32, #tpu.memory_space<vmem>>, vector<32x32xf32>
    tpu.vector_store %arg6[%c0_14, %c0_15], %28 {strides = array<i32>} : memref<32x32xf32, #tpu.memory_space<vmem>>, vector<32x32xf32>,
    return
  }
  func.func @transform_0(%arg0: i32) -> (i32, i32) {
    %c0_i32 = arith.constant 0 : i32
    %c0_i32_0 = arith.constant 0 : i32
    return %arg0, %c0_i32 : i32, i32
  }
  func.func @transform_1(%arg0: i32) -> (i32, i32) {
    %c0_i32 = arith.constant 0 : i32
    %c0_i32_0 = arith.constant 0 : i32
    %c0_i32_1 = arith.constant 0 : i32
    return %c0_i32, %c0_i32_0 : i32, i32
  }
  func.func @transform_2(%arg0: i32) -> (i32, i32) {
    %c0_i32 = arith.constant 0 : i32
    %c0_i32_0 = arith.constant 0 : i32
    %c0_i32_1 = arith.constant 0 : i32
    return %c0_i32, %c0_i32_0 : i32, i32
  }
  func.func @transform_3(%arg0: i32) -> (i32, i32) {
    %c0_i32 = arith.constant 0 : i32
    %c0_i32_0 = arith.constant 0 : i32
    %c0_i32_1 = arith.constant 0 : i32
    return %c0_i32, %c0_i32_0 : i32, i32
  }
  func.func @transform_4(%arg0: i32) -> (i32, i32) {
    %c0_i32 = arith.constant 0 : i32
    %c0_i32_0 = arith.constant 0 : i32
    %c0_i32_1 = arith.constant 0 : i32
    return %c0_i32, %c0_i32_0 : i32, i32
  }
  func.func @transform_5(%arg0: i32) -> (i32, i32) {
    %c0_i32 = arith.constant 0 : i32
    %c0_i32_0 = arith.constant 0 : i32
    return %arg0, %c0_i32 : i32, i32
  }
}

</mosaic_0001>

<bundles_post_ra>
// kernel: tpu_custom_call.1
= control target key start
LH: loop header
LB: loop body
LE: loop exit
PB: predicated region body
PF: predicated region fallthrough
CT: control target
= control target key end

     0   :  { %vm40_vm0 = vcmask 1043456   ;;  %vm33_vm1 = vcmask 64512   ;;  %s331_s0 = inlined_call_operand.vmem [shape: f32[32,8], index: 0, kind: input, shape index: {}]   ;;  %s332_s1 = inlined_call_operand.vmem [shape: bf16[8,32], index: 1, kind: input, shape index: {}]   ;;  %s333_s2 = inlined_call_operand.vmem [shape: f32[1,32], index: 2, kind: input, shape index: {}]   ;;  %s334_s3 = inlined_call_operand.vmem [shape: f32[1,32], index: 3, kind: input, shape index: {}]   ;;  %s335_s4 = inlined_call_operand.vmem [shape: f32[1,32], index: 4, kind: input, shape index: {}]   ;;  %s336_s5 = inlined_call_operand.hbm [shape: f32[32,32], index: 5, kind: output, shape index: {}]  }
   0x1   :  { %v26_v0 = vld [vmem:[%s332_s1] sm:$0xf]  ;;  %v23_v2 = vld [vmem:[%s331_s0 + $0x8] sm:$0xff]  ;;  %v24_v5 = vld [vmem:[%s331_s0 + $0x10] sm:$0xff] }
   0x2   :  { %v22_v1 = vld [vmem:[%s331_s0] sm:$0xff]  ;;  %v42_v3 = vsel %vm40_vm0, %v26_v0, 0  ;;  %v25_v6 = vld [vmem:[%s331_s0 + $0x18] sm:$0xff] }
   0x3   :  { %v27_v4 = vpack.c.bf16 %v23_v2, %v22_v1  ;;  %51 = vmatpush.bf16.msra.mxu0 %v42_v3  ;;  %199 = vmatpush.bf16.msra.mxu1 %v42_v3  ;;  %v28_v7 = vpack.c.bf16 %v25_v6, %v24_v5 }
   0x4   :  { %10 = vsyncpa [#allocation3], 0  ;;  %v204_v8 = vld [vmem:[%s333_s2] ss:$0 sm:$0xff]  ;;  %vm65_vm2 = vcmask 261120   ;;  %v243_v21 = vmov 32.0  }
   0x5   :  { %207 = vrcp.f32 %v243_v21  ;;  %s185_s8 = sshll.u32 %s336_s5, 4  ;;  %s245_s9 = smov 128   ;;  %s186_s8 = int_to_ptr.hbm [resolvable:$true] %s185_s8 }
   0x6   :  { %197 = vmatmul.msk.bf16.vlgmr.msra.gmra.mxu0 %vm33_vm1, %v27_v4  ;;  %198 = vmatmul.msk.bf16.vlgmr.msra.gmra.mxu1 %vm33_vm1, %v28_v7  ;;  %s246_s10 = smov 8  }
   0xb   :  { %v208_v22 = vpop.eup %207 }
   0xc   :  { %v79_v23 = vmul.f32 32.0, %v208_v22  ;;  %vm83_vm3 = vweird.f32 %v208_v22 }
   0xe   :  { %v80_v24 = vsub.f32 1.0, %v79_v23 }
  0x10   :  { %v81_v25 = vmul.f32 %v208_v22, %v80_v24 }
  0x12   :  { %v82_v26 = vadd.f32 %v208_v22, %v81_v25 }
  0x14   :  { %v84_v27 = vsel %vm83_vm3, %v208_v22, %v82_v26 }
  0x83   :  { %v53_v9 = vpop.f32.mrf.mxu0  ;;  %v58_v10 = vpop.f32.mrf.mxu1 }
  0x84   :  { %v54_v11 = vadd.f32 %v204_v8, %v53_v9  ;;  %v59_v12 = vadd.f32 %v204_v8, %v58_v10  ;;  %v205_v10 = vld [vmem:[%s334_s3] ss:$0 sm:$0xff]  ;;  %s244_s3 = smov [#allocation2]  }
  0x86   :  { %v72_v13 = vsel %vm65_vm2, %v59_v12, 0.0  ;;  %v66_v14 = vsel %vm65_vm2, %v54_v11, 0.0 }
  0x87   :  { %73 = vadd.xlane.f32.xlu1 %v72_v13  ;;  %67 = vadd.xlane.f32.xlu0 %v66_v14 }
  0x8b   :  { %v55_v15 = vpop.f32.mrf.mxu0  ;;  %v60_v16 = vpop.f32.mrf.mxu1 }
  0x8c   :  { %v56_v17 = vadd.f32 %v204_v8, %v55_v15  ;;  %v61_v18 = vadd.f32 %v204_v8, %v60_v16  ;;  %v206_v15 = vld [vmem:[%s335_s4] ss:$0 sm:$0xff]  ;;  %s183_s4 = sshll.u32 %s244_s3, 4  ;;  %s184_s4 = int_to_ptr.vmem [resolvable:$true] %s183_s4 }
  0x8e   :  { %v75_v19 = vsel %vm65_vm2, %v61_v18, 0.0  ;;  %v69_v20 = vsel %vm65_vm2, %v56_v17, 0.0 }
  0x8f   :  { %76 = vadd.xlane.f32.xlu1 %v75_v19  ;;  %70 = vadd.xlane.f32.xlu0 %v69_v20 }
  0xfa   :  { %v74_v28 = vpop.xlane.xlu1 %73  ;;  %v68_v29 = vpop.xlane.xlu0 %67 }
  0xfb   :  { %v87_v30 = vmul.f32 %v84_v27, %v74_v28  ;;  %v85_v31 = vmul.f32 %v84_v27, %v68_v29 }
  0xfd   :  { %v299_v32 = vsub.f32 %v59_v12, %v87_v30  ;;  %v89_v33 = vsub.f32 %v54_v11, %v85_v31 }
  0xff   :  { %v95_v34 = vmul.f32 %v299_v32, %v299_v32  ;;  %v93_v35 = vmul.f32 %v89_v33, %v89_v33 }
 0x101   :  { %v103_v36 = vsel %vm65_vm2, %v95_v34, 0.0  ;;  %v97_v37 = vsel %vm65_vm2, %v93_v35, 0.0 }
 0x102   :  { %v77_v38 = vpop.xlane.xlu1 %76  ;;  %104 = vadd.xlane.f32.xlu0 %v103_v36  ;;  %98 = vadd.xlane.f32.xlu2 %v97_v37  ;;  %v71_v39 = vpop.xlane.xlu0 %70 }
 0x103   :  { %v88_v40 = vmul.f32 %v84_v27, %v77_v38  ;;  %v86_v41 = vmul.f32 %v84_v27, %v71_v39 }
 0x105   :  { %v305_v42 = vsub.f32 %v61_v18, %v88_v40  ;;  %v307_v43 = vsub.f32 %v56_v17, %v86_v41 }
 0x107   :  { %v96_v44 = vmul.f32 %v305_v42, %v305_v42  ;;  %v94_v45 = vmul.f32 %v307_v43, %v307_v43 }
 0x109   :  { %v106_v46 = vsel %vm65_vm2, %v96_v44, 0.0  ;;  %v100_v47 = vsel %vm65_vm2, %v94_v45, 0.0 }
 0x10a   :  { %107 = vadd.xlane.f32.xlu1 %v106_v46  ;;  %101 = vadd.xlane.f32.xlu2 %v100_v47 }
 0x175   :  { %v99_v48 = vpop.xlane.xlu2 %98  ;;  %v105_v49 = vpop.xlane.xlu0 %104 }
 0x176   :  { %v109_v50 = vmul.f32 %v99_v48, %v84_v27  ;;  %v111_v51 = vmul.f32 %v105_v49, %v84_v27 }
 0x178   :  { %v113_v52 = vadd.f32 1e-05, %v109_v50  ;;  %v115_v53 = vadd.f32 1e-05, %v111_v51 }
 0x17a   :  { %209 = vrsqrt.f32 %v113_v52  ;;  %vm123_vm6 = vweird.f32 %v113_v52  ;;  %vm143_vm8 = vweird.f32 %v115_v53 }
 0x17b   :  { %211 = vrsqrt.f32 %v115_v53 }
 0x17d   :  { %v108_v54 = vpop.xlane.xlu1 %107  ;;  %v102_v55 = vpop.xlane.xlu2 %101 }
 0x17e   :  { %v112_v56 = vmul.f32 %v108_v54, %v84_v27  ;;  %v110_v57 = vmul.f32 %v102_v55, %v84_v27 }
 0x180   :  { %v210_v58 = vpop.eup %209  ;;  %v116_v59 = vadd.f32 1e-05, %v112_v56  ;;  %v114_v60 = vadd.f32 1e-05, %v110_v57 }
 0x181   :  { %v212_v61 = vpop.eup %211  ;;  %v118_v62 = vmul.f32 %v210_v58, %v113_v52  ;;  %vm124_vm4 = vweird.f32 %v210_v58 }
 0x182   :  { %v138_v63 = vmul.f32 %v212_v61, %v115_v53  ;;  %213 = vrsqrt.f32 %v116_v59  ;;  %vm144_vm5 = vweird.f32 %v212_v61  ;;  %vm125_vm7 = vmor %vm123_vm6, %vm124_vm4  ;;  %vm153_vm12 = vweird.f32 %v116_v59 }
 0x183   :  { %v119_v0 = vmul.f32 %v210_v58, %v118_v62  ;;  %215 = vrsqrt.f32 %v114_v60  ;;  %vm145_vm9 = vmor %vm143_vm8, %vm144_vm5  ;;  %vm133_vm14 = vweird.f32 %v114_v60 }
 0x184   :  { %v139_v1 = vmul.f32 %v212_v61, %v138_v63 }
 0x185   :  { %v120_v2 = vmul.f32 0.5, %v119_v0 }
 0x186   :  { %v140_v3 = vmul.f32 0.5, %v139_v1 }
 0x187   :  { %v121_v4 = vsub.f32 1.5, %v120_v2 }
 0x188   :  { %v214_v5 = vpop.eup %213  ;;  %v141_v6 = vsub.f32 1.5, %v140_v3 }
 0x189   :  { %v216_v7 = vpop.eup %215  ;;  %v122_v8 = vmul.f32 %v210_v58, %v121_v4  ;;  %v148_v9 = vmul.f32 %v214_v5, %v116_v59  ;;  %vm154_vm10 = vweird.f32 %v214_v5 }
 0x18a   :  { %v142_v11 = vmul.f32 %v212_v61, %v141_v6  ;;  %v128_v12 = vmul.f32 %v216_v7, %v114_v60  ;;  %vm134_vm11 = vweird.f32 %v216_v7  ;;  %vm155_vm13 = vmor %vm153_vm12, %vm154_vm10 }
 0x18b   :  { %v126_v13 = vsel %vm125_vm7, %v210_v58, %v122_v8  ;;  %v149_v14 = vmul.f32 %v214_v5, %v148_v9  ;;  %vm135_vm15 = vmor %vm133_vm14, %vm134_vm11 }
 0x18c   :  { %v157_v16 = vmul.f32 %v126_v13, %v89_v33  ;;  %v146_v17 = vsel %vm145_vm9, %v212_v61, %v142_v11  ;;  %v129_v18 = vmul.f32 %v216_v7, %v128_v12 }
 0x18d   :  { %v159_v19 = vmul.f32 %v146_v17, %v299_v32  ;;  %v150_v20 = vmul.f32 0.5, %v149_v14 }
 0x18e   :  { %v164_v21 = vmul.f32 %v205_v10, %v157_v16  ;;  %v130_v22 = vmul.f32 0.5, %v129_v18 }
 0x18f   :  { %v166_v23 = vmul.f32 %v205_v10, %v159_v19  ;;  %v151_v24 = vsub.f32 1.5, %v150_v20 }
 0x190   :  { %v171_v25 = vadd.f32 %v206_v15, %v164_v21  ;;  %v131_v26 = vsub.f32 1.5, %v130_v22 }
 0x191   :  { %v173_v27 = vadd.f32 %v206_v15, %v166_v23  ;;  %v152_v28 = vmul.f32 %v214_v5, %v151_v24 }
 0x192   :  { %175 = vst.msk [vmem:[#allocation2] sm:$0xff] %vm65_vm2, %v171_v25  ;;  %v132_v29 = vmul.f32 %v216_v7, %v131_v26 }
 0x193   :  { %177 = vst.msk [vmem:[#allocation2 + $0x10] sm:$0xff] %vm65_vm2, %v173_v27  ;;  %v156_v30 = vsel %vm155_vm13, %v214_v5, %v152_v28 }
 0x194   :  { %v160_v31 = vmul.f32 %v156_v30, %v305_v42  ;;  %v136_v32 = vsel %vm135_vm15, %v216_v7, %v132_v29 }
 0x195   :  { %v158_v33 = vmul.f32 %v136_v32, %v307_v43 }
 0x196   :  { %v167_v34 = vmul.f32 %v205_v10, %v160_v31 }
 0x197   :  { %v165_v35 = vmul.f32 %v205_v10, %v158_v33 }
 0x198   :  { %v174_v36 = vadd.f32 %v206_v15, %v167_v34 }
 0x199   :  { %v172_v37 = vadd.f32 %v206_v15, %v165_v35 }
 0x19a   :  { %178 = vst.msk [vmem:[#allocation2 + $0x18] sm:$0xff] %vm65_vm2, %v174_v36 }
 0x19b   :  { %176 = vst.msk [vmem:[#allocation2 + $0x8] sm:$0xff] %vm65_vm2, %v172_v37 }
 0x19c   :  { %191 = dma.vmem_to_hbm [thread:$0]  %s184_s4, 512, %s186_s8, [#allocation3], %s245_s9, %s245_s9, %s246_s10  }
 0x19d   :  { %241 = dma.done.wait [#allocation3], 512  }
 0x19e   :  { %242 = vsyncadd [#allocation3], 4294966784 }
 0x19f   :  { %196 = vsyncpa [#allocation3], 1 }

</bundles_post_ra>
